<compile_context>
chip_gen: v6e
topology: v6e:2x2x1
jax: 0.10.0
libtpu: 0.0.40
codegen_flags: <defaults>
</compile_context>

<pallas_src>
import functools

import jax
import jax.numpy as jnp
from jax import lax
from jax.experimental import pallas as pl
from jax.experimental.pallas import tpu as pltpu


def _vicreg_branch_kernel(x_ref, y_ref, out_ref, *,
                          batch_size, dim_size,
                          sim_coeff, std_coeff, cov_coeff,
                          use_bf16_mxu):
    """Grid step b==0 handles the x branch, b==1 the y branch.

    Each branch writes  std_coeff*std_term(a) + cov_coeff*cov_term(a)  for its
    own array a; branch 0 additionally adds sim_coeff * mse(x, y).  The
    wrapper sums the two per-branch partial losses.
    """
    b = pl.program_id(0)
    x = x_ref[...].astype(jnp.float32)                       # [B, D]
    y = y_ref[...].astype(jnp.float32)                       # [B, D]

    B, D = batch_size, dim_size
    inv_B = 1.0 / B
    inv_Bm1 = 1.0 / (B - 1)
    inv_D = 1.0 / D
    inv_BD = 1.0 / (B * D)

    # Select this branch's array with a scalar float mask (single VPU pass).
    w = (b == 0).astype(jnp.float32)
    a = x * w + y * (1.0 - w)                                # [B, D]

    # Center over the batch dimension.
    ac = a - jnp.sum(a, axis=0, keepdims=True) * inv_B       # [B, D]

    # Per-feature unbiased variance == diag(cov); reused for both the std term
    # and the mask-free off-diagonal identity below.
    var = jnp.sum(ac * ac, axis=0, keepdims=True) * inv_Bm1  # [1, D]
    std = jnp.sqrt(var + 1e-4)
    std_term = jnp.sum(jnp.maximum(1.0 - std, 0.0)) * (0.5 * inv_D)

    # Gram matrix on the MXU with raw (unscaled) operands.
    #   B <= D : batch Gram   G = Ac Ac^T  ([B, B])   (||Ac^T Ac||_F == ||Ac Ac^T||_F)
    #   B >  D : feature Gram G = Ac^T Ac  ([D, D])
    if B <= D:
        dn = (((1,), (1,)), ((), ()))       # contract the feature axis
    else:
        dn = (((0,), (0,)), ((), ()))       # contract the batch axis
    # TODO(synk): optional bf16 MXU operands (f32 accumulation) trade ~3 digits
    # of covariance operand precision for 3-6x matmul throughput; off by default.
    ac_mxu = ac.astype(jnp.bfloat16) if use_bf16_mxu else ac
    g = lax.dot_general(ac_mxu, ac_mxu, dimension_numbers=dn,
                        preferred_element_type=jnp.float32)

    # sum(off_diag(cov)^2) = inv_Bm1^2 * ||G||_F^2 - sum(diag(cov)^2)
    cov_term = (jnp.sum(g * g) * (inv_Bm1 * inv_Bm1)
                - jnp.sum(var * var)) * inv_D

    loss_b = std_coeff * std_term + cov_coeff * cov_term
    out_ref[...] = jnp.broadcast_to(loss_b, out_ref.shape).astype(jnp.float32)

    # Representation (MSE) term: needs both x and y, compute it once (branch 0
    # only; skipped at runtime on branch 1 thanks to pl.when).
    @pl.when(b == 0)
    def _():
        diff = x - y
        repr_loss = jnp.sum(diff * diff) * inv_BD
        out_ref[...] = out_ref[...] + sim_coeff * repr_loss


def vicreg_loss(x, y, *, sim_coeff=25.0, std_coeff=25.0, cov_coeff=1.0,
                use_bf16_mxu=False):
    """VICReg forward loss.  x, y: [batch_size, dim_size], any float dtype."""
    assert x.shape == y.shape and x.ndim == 2
    B, D = x.shape
    assert B > 1, "VICReg needs batch_size > 1 (unbiased variance / covariance)"

    kernel = functools.partial(
        _vicreg_branch_kernel,
        batch_size=B, dim_size=D,
        sim_coeff=float(sim_coeff), std_coeff=float(std_coeff),
        cov_coeff=float(cov_coeff), use_bf16_mxu=bool(use_bf16_mxu))

    # TODO(synk): for B*D too large for single-block VMEM residency, add a
    # B-chunked grid (accumulate per-feature sums, sum((x-y)^2) and raw Gram
    # partials per chunk; apply the B*mean(x)mean centering correction at the
    # end) so HBM->VMEM DMAs pipeline instead of one giant blocking block.
    partials = pl.pallas_call(
        kernel,
        out_shape=jax.ShapeDtypeStruct((2, 1, 128), jnp.float32),
        grid=(2,),
        in_specs=[pl.BlockSpec((B, D), lambda b: (0, 0)),
                  pl.BlockSpec((B, D), lambda b: (0, 0))],
        out_specs=pl.BlockSpec((1, 1, 128), lambda b: (b, 0, 0)),
        compiler_params=pltpu.CompilerParams(
            dimension_semantics=("parallel",),
            vmem_limit_bytes=48 * 1024 * 1024),
    )(x, y)
    return partials[0, 0, 0] + partials[1, 0, 0]


def _vicreg_ref(x, y, sim_coeff=25.0, std_coeff=25.0, cov_coeff=1.0):
    """Pure-JAX reference (mirrors the PyTorch module)."""
    B, D = x.shape
    repr_loss = jnp.mean((x - y) ** 2)
    xc = x - x.mean(axis=0)
    yc = y - y.mean(axis=0)
    std_x = jnp.sqrt(xc.var(axis=0, ddof=1) + 1e-4)
    std_y = jnp.sqrt(yc.var(axis=0, ddof=1) + 1e-4)
    std_loss = (jnp.mean(jnp.maximum(1 - std_x, 0.0)) / 2
                + jnp.mean(jnp.maximum(1 - std_y, 0.0)) / 2)
    cov_x = xc.T @ xc / (B - 1)
    cov_y = yc.T @ yc / (B - 1)
    off = lambda c: c - jnp.diag(jnp.diag(c))
    cov_loss = (jnp.sum(off(cov_x) ** 2) / D + jnp.sum(off(cov_y) ** 2) / D)
    return sim_coeff * repr_loss + std_coeff * std_loss + cov_coeff * cov_loss


if __name__ == "__main__":
    key = jax.random.PRNGKey(0)
    kx1, ky1, kx2, ky2 = jax.random.split(key, 4)

    # Primary shape: B <= D  -> batch-Gram ([B, B]) path.
    B1, D1 = 16, 128
    x1 = jax.random.normal(kx1, (B1, D1), dtype=jnp.float32)
    y1 = x1 + 0.1 * jax.random.normal(ky1, (B1, D1), dtype=jnp.float32)
    loss1 = vicreg_loss(x1, y1, sim_coeff=25.0, std_coeff=25.0, cov_coeff=1.0)
    jax.block_until_ready(loss1)
    ref1 = _vicreg_ref(x1, y1)
    assert jnp.allclose(loss1, ref1, rtol=2e-2, atol=2e-2), (loss1, ref1)

    # Secondary shape: B > D  -> feature-Gram ([D, D]) path.
    B2, D2 = 160, 128
    x2 = jax.random.normal(kx2, (B2, D2), dtype=jnp.float32)
    y2 = x2 + 0.1 * jax.random.normal(ky2, (B2, D2), dtype=jnp.float32)
    loss2 = vicreg_loss(x2, y2, sim_coeff=25.0, std_coeff=25.0, cov_coeff=1.0)
    jax.block_until_ready(loss2)
    ref2 = _vicreg_ref(x2, y2)
    assert jnp.allclose(loss2, ref2, rtol=2e-2, atol=2e-2), (loss2, ref2)

    print("KERNEL_OK")
</pallas_src>

<mosaic_0001>
module attributes {stable_mosaic.version = 11 : i64} {
  func.func @_vicreg_branch_kernel(%arg0: i32, %arg1: memref<16x128xf32, #tpu.memory_space<vmem>>, %arg2: memref<16x128xf32, #tpu.memory_space<vmem>>, %arg3: memref<1x1x128xf32, #tpu.memory_space<vmem>>) attributes {dimension_semantics = [#tpu.dimension_semantics<parallel>], iteration_bounds = array<i64: 2>, scalar_prefetch = 0 : i64, scratch_operands = 0 : i64, tpu.core_type = #tpu.core_type<tc>, window_params = [{pipeline_mode = #tpu.pipeline_mode<synchronous>, transform_indices = @transform_0, window_bounds = array<i64: 16, 128>}, {pipeline_mode = #tpu.pipeline_mode<synchronous>, transform_indices = @transform_1, window_bounds = array<i64: 16, 128>}, {transform_indices = @transform_2, window_bounds = array<i64: 1, 1, 128>}]} {
    %c0 = arith.constant 0 : index
    %c0_0 = arith.constant 0 : index
    %0 = vector.load %arg1[%c0, %c0_0] : memref<16x128xf32, #tpu.memory_space<vmem>>, vector<16x128xf32>
    %c0_1 = arith.constant 0 : index
    %c0_2 = arith.constant 0 : index
    %1 = vector.load %arg2[%c0_1, %c0_2] : memref<16x128xf32, #tpu.memory_space<vmem>>, vector<16x128xf32>
    %c0_i32 = arith.constant 0 : i32
    %2 = arith.cmpi eq, %arg0, %c0_i32 : i32
    %3 = arith.extui %2 : i1 to i32
    %4 = arith.sitofp %3 : i32 to f32
    %5 = vector.broadcast %4 : f32 to vector<16x128xf32>
    %6 = arith.mulf %0, %5 : vector<16x128xf32>
    %cst = arith.constant 1.000000e+00 : f32
    %7 = arith.subf %cst, %4 : f32
    %8 = vector.broadcast %7 : f32 to vector<16x128xf32>
    %9 = arith.mulf %1, %8 : vector<16x128xf32>
    %10 = arith.addf %6, %9 : vector<16x128xf32>
    %cst_3 = arith.constant dense<0.000000e+00> : vector<128xf32>
    %11 = vector.multi_reduction <add>, %10, %cst_3 [0] : vector<16x128xf32> to vector<128xf32>
    %12 = vector.shape_cast %11 : vector<128xf32> to vector<1x128xf32>
    %cst_4 = arith.constant 6.250000e-02 : f32
    %13 = vector.broadcast %cst_4 : f32 to vector<1x128xf32>
    %14 = arith.mulf %12, %13 : vector<1x128xf32>
    %15 = vector.broadcast %14 : vector<1x128xf32> to vector<16x128xf32>
    %16 = arith.subf %10, %15 : vector<16x128xf32>
    %17 = arith.mulf %16, %16 : vector<16x128xf32>
    %cst_5 = arith.constant dense<0.000000e+00> : vector<128xf32>
    %18 = vector.multi_reduction <add>, %17, %cst_5 [0] : vector<16x128xf32> to vector<128xf32>
    %19 = vector.shape_cast %18 : vector<128xf32> to vector<1x128xf32>
    %cst_6 = arith.constant 0.0666666701 : f32
    %20 = vector.broadcast %cst_6 : f32 to vector<1x128xf32>
    %21 = arith.mulf %19, %20 : vector<1x128xf32>
    %cst_7 = arith.constant 9.99999974E-5 : f32
    %22 = vector.broadcast %cst_7 : f32 to vector<1x128xf32>
    %23 = arith.addf %21, %22 : vector<1x128xf32>
    %24 = math.sqrt %23 : vector<1x128xf32>
    %cst_8 = arith.constant 1.000000e+00 : f32
    %25 = vector.broadcast %cst_8 : f32 to vector<1x128xf32>
    %26 = arith.subf %25, %24 : vector<1x128xf32>
    %cst_9 = arith.constant 0.000000e+00 : f32
    %27 = vector.broadcast %cst_9 : f32 to vector<1x128xf32>
    %28 = arith.maximumf %26, %27 : vector<1x128xf32>
    %29 = vector.shape_cast %28 : vector<1x128xf32> to vector<1x1x128xf32>
    %cst_10 = arith.constant dense<0.000000e+00> : vector<1xf32>
    %30 = vector.multi_reduction <add>, %29, %cst_10 [1, 2] : vector<1x1x128xf32> to vector<1xf32>
    %31 = vector.shape_cast %30 : vector<1xf32> to vector<1x1x1xf32>
    %32 = vector.extract %31[0, 0, 0] : f32 from vector<1x1x1xf32>
    %cst_11 = arith.constant 3.906250e-03 : f32
    %33 = arith.mulf %32, %cst_11 : f32
    %cst_12 = arith.constant dense<0.000000e+00> : vector<16x16xf32>
    %34 = tpu.matmul %16, %16, %cst_12 {dimension_numbers = #tpu.dot_dimension_numbers<[1], [1], [0], [0], [0, 0, 1, 0], [], []>} : vector<16x128xf32>, vector<16x128xf32>, vector<16x16xf32> -> vector<16x16xf32>
    %35 = arith.mulf %34, %34 : vector<16x16xf32>
    %36 = vector.shape_cast %35 : vector<16x16xf32> to vector<1x16x16xf32>
    %cst_13 = arith.constant dense<0.000000e+00> : vector<1xf32>
    %37 = vector.multi_reduction <add>, %36, %cst_13 [1, 2] : vector<1x16x16xf32> to vector<1xf32>
    %38 = vector.shape_cast %37 : vector<1xf32> to vector<1x1x1xf32>
    %39 = vector.extract %38[0, 0, 0] : f32 from vector<1x1x1xf32>
    %cst_14 = arith.constant 0.00444444455 : f32
    %40 = arith.mulf %39, %cst_14 : f32
    %41 = arith.mulf %21, %21 : vector<1x128xf32>
    %42 = vector.shape_cast %41 : vector<1x128xf32> to vector<1x1x128xf32>
    %cst_15 = arith.constant dense<0.000000e+00> : vector<1xf32>
    %43 = vector.multi_reduction <add>, %42, %cst_15 [1, 2] : vector<1x1x128xf32> to vector<1xf32>
    %44 = vector.shape_cast %43 : vector<1xf32> to vector<1x1x1xf32>
    %45 = vector.extract %44[0, 0, 0] : f32 from vector<1x1x1xf32>
    %46 = arith.subf %40, %45 : f32
    %cst_16 = arith.constant 7.812500e-03 : f32
    %47 = arith.mulf %46, %cst_16 : f32
    %cst_17 = arith.constant 2.500000e+01 : f32
    %48 = arith.mulf %cst_17, %33 : f32
    %cst_18 = arith.constant 1.000000e+00 : f32
    %49 = arith.mulf %cst_18, %47 : f32
    %50 = arith.addf %48, %49 : f32
    %51 = vector.broadcast %50 : f32 to vector<1x1x128xf32>
    %c0_19 = arith.constant 0 : index
    %c0_20 = arith.constant 0 : index
    %c0_21 = arith.constant 0 : index
    %52 = vector.load %arg3[%c0_19, %c0_20, %c0_21] : memref<1x1x128xf32, #tpu.memory_space<vmem>>, vector<1x1x128xf32>
    tpu.vector_store %arg3[%c0_19, %c0_20, %c0_21], %51 {strides = array<i32>} : memref<1x1x128xf32, #tpu.memory_space<vmem>>, vector<1x1x128xf32>,
    %c0_i32_22 = arith.constant 0 : i32
    %53 = arith.cmpi eq, %arg0, %c0_i32_22 : i32
    %54 = arith.extui %53 : i1 to i32
    %c0_i32_23 = arith.constant 0 : i32
    %55 = arith.cmpi ne, %54, %c0_i32_23 : i32
    scf.if %55 {
      %56 = arith.subf %0, %1 : vector<16x128xf32>
      %57 = arith.mulf %56, %56 : vector<16x128xf32>
      %58 = vector.shape_cast %57 : vector<16x128xf32> to vector<1x16x128xf32>
      %cst_24 = arith.constant dense<0.000000e+00> : vector<1xf32>
      %59 = vector.multi_reduction <add>, %58, %cst_24 [1, 2] : vector<1x16x128xf32> to vector<1xf32>
      %60 = vector.shape_cast %59 : vector<1xf32> to vector<1x1x1xf32>
      %61 = vector.extract %60[0, 0, 0] : f32 from vector<1x1x1xf32>
      %cst_25 = arith.constant 4.8828125E-4 : f32
      %62 = arith.mulf %61, %cst_25 : f32
      %c0_26 = arith.constant 0 : index
      %c0_27 = arith.constant 0 : index
      %c0_28 = arith.constant 0 : index
      %63 = vector.load %arg3[%c0_26, %c0_27, %c0_28] : memref<1x1x128xf32, #tpu.memory_space<vmem>>, vector<1x1x128xf32>
      %cst_29 = arith.constant 2.500000e+01 : f32
      %64 = arith.mulf %cst_29, %62 : f32
      %65 = vector.broadcast %64 : f32 to vector<1x1x128xf32>
      %66 = arith.addf %63, %65 : vector<1x1x128xf32>
      %c0_30 = arith.constant 0 : index
      %c0_31 = arith.constant 0 : index
      %c0_32 = arith.constant 0 : index
      %67 = vector.load %arg3[%c0_30, %c0_31, %c0_32] : memref<1x1x128xf32, #tpu.memory_space<vmem>>, vector<1x1x128xf32>
      tpu.vector_store %arg3[%c0_30, %c0_31, %c0_32], %66 {strides = array<i32>} : memref<1x1x128xf32, #tpu.memory_space<vmem>>, vector<1x1x128xf32>,
    } else {
    }
    return
  }
  func.func @transform_0(%arg0: i32) -> (i32, i32) {
    %c0_i32 = arith.constant 0 : i32
    %c0_i32_0 = arith.constant 0 : i32
    %c0_i32_1 = arith.constant 0 : i32
    return %c0_i32, %c0_i32_0 : i32, i32
  }
  func.func @transform_1(%arg0: i32) -> (i32, i32) {
    %c0_i32 = arith.constant 0 : i32
    %c0_i32_0 = arith.constant 0 : i32
    %c0_i32_1 = arith.constant 0 : i32
    return %c0_i32, %c0_i32_0 : i32, i32
  }
  func.func @transform_2(%arg0: i32) -> (i32, i32, i32) {
    %c0_i32 = arith.constant 0 : i32
    %c0_i32_0 = arith.constant 0 : i32
    %c0_i32_1 = arith.constant 0 : i32
    return %arg0, %c0_i32, %c0_i32_0 : i32, i32, i32
  }
}

</mosaic_0001>

<bundles_post_ra>
// kernel: tpu_custom_call.1
= control target key start
LH: loop header
LB: loop body
LE: loop exit
PB: predicated region body
PF: predicated region fallthrough
CT: control target
= control target key end

     0   :  { %7 = vsyncpa [#allocation3], 0  ;;  %s802_s0 = inlined_call_operand.hbm [shape: f32[16,128], index: 0, kind: input, shape index: {}]   ;;  %s803_s1 = inlined_call_operand.hbm [shape: f32[16,128], index: 1, kind: input, shape index: {}]   ;;  %s804_s2 = inlined_call_operand.hbm [shape: f32[2,1,128], index: 2, kind: output, shape index: {}]  }
   0x1   :  { %8 = vsyncpa [#allocation6], 0 }
   0x2   :  { %9 = vsyncpa [#allocation4], 0 }
   0x3   :  { %11 = vsyncpa [#allocation4 + $0x1], 0  ;;  %s654_s9 = smov 0   ;;  %s656_s10 = smov 0  }
   0x4   :  { %s658_s11 = smov 0   ;;  %s660_s12 = smov 0  }
   0x5 LB: > { %s675_s13 = sadd.s32 4294967295, %s632_s12   ;;  %s418_s14 = sadd.s32 4294967294, %s632_s12   ;;  %s632_s12 = sphi %s660_s12, %s820_s12   ;;  %s628_s11 = sphi %s658_s11, %s819_s11   ;;  %s624_s10 = sphi %s656_s10, %s818_s10   ;;  %s620_s9 = sphi %s654_s9, %s817_s9  }
   0x6   : > { %s679_s15 = sadd.s32 1, %s632_s12   ;;  %s66_s16 = sadd.s32 1, %s628_s11 }
   0x7   : > { %s63_s17 = ssub.s32 %s632_s12, %s679_s15  ;;  %p76_p0 = scmp.ne.s32.totalorder %s628_s11, %s624_s10 }
   0x8   : > { %p64_p1 = scmp.eq.s32.totalorder %s63_s17, 0  ;;  %p77_p2 = scmp.eq.s32.totalorder %s675_s13, 1 }
   0x9   : > { %p82_p3 = scmp.ne.s32.totalorder %s624_s10, %s620_s9  ;;  %p83_p4 = scmp.eq.s32.totalorder %s418_s14, 1 }
   0xa   : > { %s690_s18 = scalar_select %p64_p1, %s628_s11, %s66_s16  }
   0xb   : > { %p692_p5 = por %p77_p2, %p76_p0  ;;  %p696_p6 = por %p83_p4, %p82_p3 }
   0xc   : > { %p419_p7 = scmp.ge.s32.totalorder %s632_s12, 1  ;;  %p90_p8 = scmp.lt.s32.totalorder %s632_s12, 3 }
   0xd   : > { %s807_s20 = scalar_select %p696_p6, 1, 0 }
   0xe   : > { %p805_p10 = scmp.eq.s32.totalorder %s675_s13, 0  ;;  %p704_p11 = pnand %p419_p7, %p90_p8 }
   0xf   : > { %s634_s22 = smov [#allocation2]   ;;  %s635_s25 = smov [#allocation5]  }
  0x10   : > { %s102_s23 = sshll.u32 %s634_s22, 4  ;;  %p458_p12 = pneg %p704_p11  ;;  %s103_s23 = int_to_ptr.vmem [resolvable:$true] %s102_s23 }
  0x11   : > { %s115_s26 = sshll.u32 %s635_s25, 4  ;;  %s523_s27 = scalar_lea.vmem %s103_s23, 256  ;;  %s116_s26 = int_to_ptr.vmem [resolvable:$true] %s115_s26 }
  0x12   : > { %p712_p13 = pnand %p805_p10, %p458_p12  ;;  %p524_p1 = scmp.ne.s32.totalorder %s103_s23, %s523_s27 }
  0x13   : > { %p531_p4 = scmp.lt.s32.totalorder %s103_s23, %s103_s23  ;;  %p532_p7 = scmp.lt.s32.totalorder %s523_s27, %s523_s27 }
  0x14   : > { %p514_p0 = pneg %p712_p13 }
  0x15   : > { %p533_p8 = por %p532_p7, %p531_p4 }
  0x16   : > { %p526_p2 = pnand %p524_p1, %p514_p0 }
  0x18   : > { %p527_p3 = pneg %p526_p2 }
  0x1a   : > { %p534_p12 = pnand %p533_p8, %p527_p3 }
  0x1c   : > { %537 = shalt.err (!%p534_p12)
}
  0x1d   : > { %s636_s28 = smov 128   ;;  %s637_s29 = smov 8  }
  0x1e   : > { %461 = dma.hbm_to_vmem [thread:$0]  (!%p712_p13), %s802_s0, 256, %s103_s23, [#allocation3], %s636_s28, %s636_s28, %s637_s29  }
  0x1f   : > { %s549_s4 = scalar_lea.vmem %s116_s26, 256  ;;  %p557_p10 = scmp.lt.s32.totalorder %s116_s26, %s116_s26 }
  0x20   : > { %p550_p9 = scmp.ne.s32.totalorder %s116_s26, %s549_s4  ;;  %p558_p6 = scmp.lt.s32.totalorder %s549_s4, %s549_s4 }
  0x22   : > { %p552_p1 = pnand %p550_p9, %p514_p0  ;;  %p559_p4 = por %p558_p6, %p557_p10 }
  0x24   : > { %p553_p2 = pneg %p552_p1 }
  0x26   : > { %p560_p3 = pnand %p559_p4, %p553_p2 }
  0x28   : > { %563 = shalt.err (!%p560_p3)
}
  0x29   : > { %464 = dma.hbm_to_vmem [thread:$0]  (!%p712_p13), %s803_s1, 256, %s116_s26, [#allocation6], %s636_s28, %s636_s28, %s637_s29  }
  0x2a   : > { %131 = sbr.rel (%p704_p11) target bundleno = 737 (0x2e1), region = 28  ;;  %p810_p7 = scmp.eq.s32.totalorder (!%p704_p11), %s675_s13, 0 }
  0x2f   : > { %607 = dma.done.wait (%p810_p7), [#allocation3], 256   ;;  %p811_p9 = pmov %p810_p7 }
  0x30   : > { %p812_p0 = pmov %p810_p7 }
  0x31   : > { %609 = vsyncadd (%p811_p9), [#allocation3], 4294967040 }
  0x32   : > { %611 = dma.done.wait (%p812_p0), [#allocation6], 256   ;;  %p813_p6 = pmov %p812_p0 }
  0x33   : > { %p814_p10 = pmov %p812_p0  ;;  %v746_v2 = vld [vmem:[#allocation2] sm:$0xff]  ;;  %v748_v3 = vld [vmem:[#allocation2 + $0x8] sm:$0xff]  ;;  %v750_v4 = vld [vmem:[#allocation5] sm:$0xff]  ;;  %vm197_vm2 = vcmask 1040384   ;;  %vm286_vm3 = vcmask 130048   ;;  %s149_s26 = sand.u32 1, %s624_s10  }
  0x34   : > { %613 = vsyncadd (%p813_p6), [#allocation6], 4294967040  ;;  %v752_v5 = vld [vmem:[#allocation5 + $0x8] sm:$0xff]  ;;  %s150_s29 = scalar_lea.vmem [#allocation7], %s149_s26  ;;  %p815_p11 = scmp.ne.s32.totalorder %s675_s13, 0 }
  0x35   : > { %s156_s7 = scalar_select %p814_p10, 1, 0 }
  0x37   : > { %s157_s8 = scvt.s32.f32 %s156_s7 }
  0x39   : > { %s161_s14 = ssub.f32 1.0, %s157_s8  ;;  %v158_v0 = vstv %s157_s8 }
  0x3a   : > { %v159_v6 = vmul.f32 %v158_v0, %v746_v2  ;;  %v160_v7 = vmul.f32 %v158_v0, %v748_v3 }
  0x3b   : > { %v162_v1 = vstv %s161_s14 }
  0x3c   : > { %v163_v8 = vmul.f32 %v162_v1, %v750_v4  ;;  %v164_v9 = vmul.f32 %v162_v1, %v752_v5 }
  0x3e   : > { %v165_v10 = vadd.f32 %v163_v8, %v159_v6  ;;  %v166_v11 = vadd.f32 %v164_v9, %v160_v7 }
  0x40   : > { %v167_v12 = vadd.f32 %v166_v11, %v165_v10 }
  0x42   : > { %v168_v13 = vrot.slane %v167_v12, 4 }
  0x44   : > { %v169_v14 = vadd.f32 %v168_v13, %v167_v12 }
  0x46   : > { %v170_v15 = vrot.slane %v169_v14, 2 }
  0x48   : > { %v171_v16 = vadd.f32 %v170_v15, %v169_v14 }
  0x4a   : > { %v172_v17 = vrot.slane %v171_v16, 1 }
  0x4c   : > { %v173_v18 = vadd.f32 %v172_v17, %v171_v16 }
  0x4e   : > { %v174_v19 = vmul.f32 0.0625, %v173_v18 }
  0x50   : > { %v176_v20 = vsub.f32 %v166_v11, %v174_v19  ;;  %v175_v21 = vsub.f32 %v165_v10, %v174_v19 }
  0x52   : > { %v178_v22 = vmul.f32 %v176_v20, %v176_v20  ;;  %433 = vmatprep.subr.mxu0 %v176_v20  ;;  %v177_v23 = vmul.f32 %v175_v21, %v175_v21  ;;  %437 = vmatprep.mubr.f32.mxu0 %v175_v21 }
  0x53   : > { %434 = vmatpush3.xpose.msra.mxu0 %v176_v20 }
  0x54   : > { %v179_v24 = vadd.f32 %v178_v22, %v177_v23  ;;  %435 = vmatprep.subr.mxu0 %v175_v21 }
  0x56   : > { %v180_v25 = vrot.slane %v179_v24, 4 }
  0x57   : > { %436 = vmatpush3.xpose.msra.mxu0 %v175_v21 }
  0x58   : > { %v181_v26 = vadd.f32 %v180_v25, %v179_v24 }
  0x5a   : > { %v182_v27 = vrot.slane %v181_v26, 2  ;;  %438 = vmatmul.mubr.f32.vlgmr.msra.gmra.mxu0 %v176_v20 }
  0x5c   : > { %v183_v28 = vadd.f32 %v182_v27, %v181_v26 }
  0x5e   : > { %v184_v29 = vrot.slane %v183_v28, 1 }
  0x60   : > { %v185_v30 = vadd.f32 %v184_v29, %v183_v28 }
  0x62   : > { %v186_v31 = vmul.f32 0.06666667, %v185_v30 }
  0x64   : > { %v187_v32 = vadd.f32 0.0001, %v186_v31  ;;  %v300_v41 = vmul.f32 %v186_v31, %v186_v31 }
  0x66   : > { %510 = vrsqrt.f32 %v187_v32  ;;  %vm190_vm0 = vcmp.eq.f32.partialorder %v187_v32, inf  ;;  %v193_v34 = vand.u32 2147483648, %v187_v32  ;;  %vm192_vm1 = vcmp.eq.f32.partialorder %v187_v32, 0.0 }
  0x67   : > { %v301_v42 = vsel %vm197_vm2, %v300_v41, 0.0 }
  0x68   : > { %302 = vadd.xlane.f32.xlu1 %v301_v42 }
  0x73   : > { %v511_v33 = vpop.eup %510 }
  0x74   : > { %v189_v35 = vmul.f32 %v511_v33, %v187_v32 }
  0x76   : > { %v191_v36 = vsel %vm190_vm0, %v187_v32, %v189_v35 }
  0x77   : > { %v194_v37 = vsel %vm192_vm1, %v193_v34, %v191_v36 }
  0x78   : > { %v195_v38 = vsub.f32 1.0, %v194_v37 }
  0x7a   : > { %v196_v39 = vmax.f32 %v195_v38, 0.0 }
  0x7c   : > { %v198_v40 = vsel %vm197_vm2, %v196_v39, 0.0 }
  0x7d   : > { %199 = vadd.xlane.f32.xlu0 %v198_v40 }
  0xf1   : > { %v303_v57 = vpop.xlane.xlu1 %302 }
  0xf2   : > { %v304_v58 = vrot.slane %v303_v57, 4 }
  0xf4   : > { %v305_v59 = vadd.f32 %v304_v58, %v303_v57 }
  0xf6   : > { %v306_v60 = vrot.slane %v305_v59, 2 }
  0xf8   : > { %v307_v0 = vadd.f32 %v306_v60, %v305_v59 }
  0xfa   : > { %v308_v7 = vrot.slane %v307_v0, 1 }
  0xfc   : > { %v309_v10 = vadd.f32 %v308_v7, %v307_v0 }
 0x106   : > { %v200_v43 = vpop.xlane.xlu0 %199 }
 0x107   : > { %v201_v47 = vrot.slane %v200_v43, 4 }
 0x109   : > { %v202_v52 = vadd.f32 %v201_v47, %v200_v43 }
 0x10b   : > { %v203_v53 = vrot.slane %v202_v52, 2 }
 0x10d   : > { %v204_v54 = vadd.f32 %v203_v53, %v202_v52 }
 0x10f   : > { %v205_v55 = vrot.slane %v204_v54, 1 }
 0x111   : > { %v206_v56 = vadd.f32 %v205_v55, %v204_v54 }
 0x113   : > { %440 = vpush %v206_v56 }
 0x11a   : > { %v439_v44 = vpop.f32.mrf.mxu0 }
 0x11b   : > { %v285_v45 = vmul.f32 %v439_v44, %v439_v44 }
 0x11c   : > { %v275_v46 = vpop.f32.mrf.mxu0 }
 0x11d   : > { %v284_v48 = vmul.f32 %v275_v46, %v275_v46  ;;  %v288_v50 = vsel %vm286_vm3, %v285_v45, 0.0 }
 0x11f   : > { %v287_v49 = vsel %vm286_vm3, %v284_v48, 0.0 }
 0x120   : > { %v289_v51 = vadd.f32 %v288_v50, %v287_v49 }
 0x122   : > { %290 = vadd.xlane.f32.xlu0 %v289_v51 }
 0x144   : > { %s441_s16 = spop %440 }
 0x145   : > { %s208_s17 = smul.f32 0.00390625, %s441_s16 }
 0x147   : > { %s313_s25 = smul.f32 25.0, %s208_s17 }
 0x1ab   : > { %v291_v61 = vpop.xlane.xlu0 %290 }
 0x1ac   : > { %v292_v62 = vrot.slane %v291_v61, 4 }
 0x1ae   : > { %v293_v63 = vadd.f32 %v292_v62, %v291_v61 }
 0x1b0   : > { %v294_v1 = vrot.slane %v293_v63, 2 }
 0x1b2   : > { %v295_v6 = vadd.f32 %v294_v1, %v293_v63 }
 0x1b4   : > { %v296_v8 = vrot.slane %v295_v6, 1 }
 0x1b6   : > { %v297_v9 = vadd.f32 %v296_v8, %v295_v6 }
 0x1b8   : > { %442 = vpush %v297_v9 }
 0x1b9   : > { %444 = vpush %v309_v10 }
 0x1e9   : > { %s443_s21 = spop %442 }
 0x1ea   : > { %s299_s22 = smul.f32 0.0044444446, %s443_s21  ;;  %s445_s23 = spop %444 }
 0x1ec   : > { %s311_s24 = ssub.f32 %s299_s22, %s445_s23 }
 0x1ee   : > { %s312_s27 = smul.f32 0.0078125, %s311_s24 }
 0x1ef   : > { %319 = sbr.rel (%p815_p11) target bundleno = 714 (0x2ca), region = 40 }
 0x1f0   : > { %s314_s28 = sadd.f32 %s313_s25, %s312_s27 }
 0x1f2   : > { %v315_v11 = vstv %s314_s28 }
 0x1f3   : > { %316 = vst [vmem:[%s150_s29] sm:$0x1] %v315_v11 }
 0x1f4   : > { %v320_v12 = vsub.f32 %v746_v2, %v750_v4  ;;  %v321_v13 = vsub.f32 %v748_v3, %v752_v5 }
 0x1f6   : > { %v322_v14 = vmul.f32 %v320_v12, %v320_v12  ;;  %v323_v15 = vmul.f32 %v321_v13, %v321_v13 }
 0x1f8   : > { %v324_v16 = vadd.f32 %v323_v15, %v322_v14 }
 0x1fa   : > { %325 = vadd.xlane.f32.xlu0 %v324_v16  ;;  %v335_v24 = vld [vmem:[%s150_s29] sm:$0x1] }
 0x283   : > { %v326_v17 = vpop.xlane.xlu0 %325 }
 0x284   : > { %v327_v18 = vrot.slane %v326_v17, 4 }
 0x286   : > { %v328_v19 = vadd.f32 %v327_v18, %v326_v17 }
 0x288   : > { %v329_v20 = vrot.slane %v328_v19, 2 }
 0x28a   : > { %v330_v21 = vadd.f32 %v329_v20, %v328_v19 }
 0x28c   : > { %v331_v22 = vrot.slane %v330_v21, 1 }
 0x28e   : > { %v332_v23 = vadd.f32 %v331_v22, %v330_v21 }
 0x290   : > { %446 = vpush %v332_v23 }
 0x2c1   : > { %s447_s30 = spop %446 }
 0x2c2   : > { %s334_s3 = smul.f32 0.00048828125, %s447_s30 }
 0x2c4   : > { %s336_s4 = smul.f32 25.0, %s334_s3 }
 0x2c6   : > { %v337_v2 = vstv %s336_s4 }
 0x2c7   : > { %v338_v4 = vadd.f32 %v337_v2, %v335_v24 }
 0x2c9   : > { %339 = vst [vmem:[%s150_s29] sm:$0x1] %v338_v4 }
 0x2ca PF: > { %s426_s5 = sshll.u32 %s675_s13, 4  ;;  %s353_s14 = sshll.u32 %s150_s29, 4  ;;  %s354_s14 = int_to_ptr.vmem [resolvable:$true] %s353_s14 }
 0x2cb   : > { %s351_s8 = scalar_lea.hbm %s804_s2, %s426_s5  ;;  %s341_s16 = scalar_lea.sflag [#allocation4], %s149_s26 }
 0x2cc   : > { %s564_s17 = scalar_lea.vmem %s354_s14, 16  ;;  %s638_s21 = smov [#allocation7]  }
 0x2cd   : > { %p565_p13 = scmp.ne.s32.totalorder %s354_s14, %s564_s17  ;;  %s568_s22 = sshll.u32 %s638_s21, 4  ;;  %s569_s22 = int_to_ptr.vmem [resolvable:$false] %s568_s22 }
 0x2ce   : > { %s570_s23 = scalar_lea.vmem %s569_s22, 32  ;;  %p571_p1 = scmp.lt.s32.totalorder %s354_s14, %s569_s22 }
 0x2cf   : > { %p566_p8 = pnand %p565_p13, %p692_p5  ;;  %p572_p2 = scmp.lt.s32.totalorder %s570_s23, %s564_s17 }
 0x2d1   : > { %p567_p12 = pneg %p566_p8  ;;  %p573_p4 = por %p572_p2, %p571_p1 }
 0x2d3   : > { %p574_p3 = pnand %p573_p4, %p567_p12 }
 0x2d5   : > { %577 = shalt.err (!%p574_p3)
}
 0x2d6   : > { %s578_s13 = scalar_lea.hbm %s351_s8, 16  ;;  %s582_s26 = scalar_lea.hbm %s804_s2, 32 }
 0x2d7   : > { %p579_p7 = scmp.ne.s32.totalorder %s351_s8, %s578_s13  ;;  %p583_p6 = scmp.lt.s32.totalorder %s351_s8, %s804_s2 }
 0x2d8   : > { %p584_p10 = scmp.lt.s32.totalorder %s582_s26, %s578_s13 }
 0x2d9   : > { %p580_p9 = pnand %p579_p7, %p692_p5 }
 0x2da   : > { %p585_p11 = por %p584_p10, %p583_p6 }
 0x2db   : > { %p581_p0 = pneg %p580_p9 }
 0x2dd   : > { %p586_p13 = pnand %p585_p11, %p581_p0 }
 0x2df   : > { %589 = shalt.err (!%p586_p13)
}
 0x2e0   : > { %456 = dma.vmem_to_hbm [thread:$0]  (%p692_p5), %s354_s14, 16, %s351_s8, %s341_s16  }
 0x2e1 PF: > { %p473_p8 = scmp.ge.s32.totalorder %s632_s12, 2  ;;  %s365_s29 = sand.u32 1, %s620_s9  }
 0x2e2   : > { %p816_p12 = scmp.ne.s32.totalorder %s807_s20, 0  ;;  %s366_s30 = scalar_lea.sflag [#allocation4], %s365_s29 }
 0x2e4   : > { %p466_p1 = pnand %p473_p8, %p816_p12 }
 0x2e6   : > { %p467_p2 = pneg %p466_p1 }
 0x2e8   : > { %615 = dma.done.wait (%p467_p2), %s366_s30, 16  }
 0x2e9   : > { %617 = vsyncadd (%p467_p2), %s366_s30, 4294967280  ;;  %p14_p4 = scmp.ge.s32.totalorder %s679_s15, 4   ;;  %s817_s9 = smov %s624_s10 }
 0x2ea   : > { %s818_s10 = smov %s628_s11  ;;  %s819_s11 = smov %s690_s18 }
 0x2eb   : > { %s820_s12 = smov %s679_s15  ;;  %16 = sbr.rel (!%p14_p4) target bundleno = 5 (0x5), region = 73 }
 0x2f0   :  { %370 = vsyncpa [#allocation3], 1 }
 0x2f1   :  { %372 = vsyncpa [#allocation3 + $0x1], 1 }
 0x2f2   :  { %373 = vsyncpa [#allocation6], 1 }
 0x2f3   :  { %374 = vsyncpa [#allocation4], 1 }
 0x2f4   :  { %376 = vsyncpa [#allocation4 + $0x1], 1 }

</bundles_post_ra>
